<compile_context>
chip_gen: v7x
topology: tpu7x:2x2x1
jax: 0.10.0
libtpu: 0.0.40
codegen_flags: <defaults>
</compile_context>

<pallas_src>
import functools

import jax
import jax.numpy as jnp
from jax.experimental import pallas as pl
from jax.experimental.pallas import tpu as pltpu


def _round_up(x, m):
    return (x + m - 1) // m * m


def _choose_tile(B):
    """Batch tile: big tiles, >=2 grid steps once there is enough work."""
    B8 = _round_up(max(B, 8), 8)
    if B8 <= 256:
        return B8                        # single tile; overhead-dominated
    n_steps = max(2, -(-B8 // 2048))     # >=2 steps (v7x TCs), tiles <= ~2048
    return _round_up(-(-B8 // n_steps), 8)


# ----------------------------------------------------------------------------
# Pallas kernel: int32 phase -> fused (embedding+in_fc) -> hid_fc -> heads.
#   phase  : (TB, 1)  int32 in [0, k)
#   fused  : (K_pad, W)  rows = phase_table @ [actor_in | critic_in] + b_in
#   w_hid  : (W, W)   block-diagonal [actor_hid | critic_hid]
#   consts : (8, W)   row0 = b_hid, row1 = critic_out_w (lanes [H,2H)),
#                     row2 lane0 = critic_out_b
#   actor  : (TB, H)  output
#   critic : (TB, 1)  output
# ----------------------------------------------------------------------------
def mlp_simple_phase_kernel(phase_ref, fused_ref, w_hid_ref, consts_ref,
                            actor_ref, critic_ref, *, hid_sz):
    TB = phase_ref.shape[0]
    K_pad = fused_ref.shape[0]
    H = hid_sz

    phase = phase_ref[...]                                   # (TB, 1) int32

    # Embedding lookup + first linear layer as ONE exact one-hot matmul
    # (fused already contains table @ w_in + b_in).
    lane = jax.lax.broadcasted_iota(jnp.int32, (TB, K_pad), 1)
    onehot = (lane == phase).astype(jnp.float32)             # (TB, K_pad)
    h = jnp.tanh(jnp.dot(onehot, fused_ref[...],
                         preferred_element_type=jnp.float32))  # (TB, W)

    # Fused actor|critic hidden layer (block-diagonal weights).
    b_hid = consts_ref[0:1, :]                               # (1, W)
    h = jnp.tanh(jnp.dot(h, w_hid_ref[...],
                         preferred_element_type=jnp.float32) + b_hid)

    # Critic head (out_features = 1): VPU multiply + lane reduction instead of
    # an N=1 MXU matmul. cout_w is zero outside the critic lanes.
    cout_w = consts_ref[1:2, :]                              # (1, W)
    cout_b = consts_ref[2:3, 0:1]                            # (1, 1)
    critic = jnp.sum(h * cout_w, axis=-1, keepdims=True) + cout_b

    actor_ref[...] = h[:, :H].astype(actor_ref.dtype)
    critic_ref[...] = critic.astype(critic_ref.dtype)


# ----------------------------------------------------------------------------
# Parameter construction (mirrors init_normc_ weights + zero bias, and
# nn.Embedding's default N(0, 1)). Linear weights stored as (in, out).
# ----------------------------------------------------------------------------
def _normc_linear(key, in_f, out_f):
    w = jax.random.normal(key, (out_f, in_f), dtype=jnp.float32)  # torch layout
    w = w / jnp.sqrt(jnp.sum(w * w, axis=1, keepdims=True))       # normc over in
    return jnp.transpose(w), jnp.zeros((out_f,), dtype=jnp.float32)


def make_params(key, opt):
    P, H, k = opt['phase_hid_sz'], opt['hid_sz'], opt['phase_period']
    ks = jax.random.split(key, 6)
    phase_table = jax.random.normal(ks[0], (k, P), dtype=jnp.float32)
    a_in_w, a_in_b = _normc_linear(ks[1], P, H)
    a_hid_w, a_hid_b = _normc_linear(ks[2], H, H)
    c_in_w, c_in_b = _normc_linear(ks[3], P, H)
    c_hid_w, c_hid_b = _normc_linear(ks[4], H, H)
    c_out_w, c_out_b = _normc_linear(ks[5], H, 1)      # (H, 1), (1,)
    return dict(phase_table=phase_table,
                actor_in_w=a_in_w, actor_in_b=a_in_b,
                actor_hid_w=a_hid_w, actor_hid_b=a_hid_b,
                critic_in_w=c_in_w, critic_in_b=c_in_b,
                critic_hid_w=c_hid_w, critic_hid_b=c_hid_b,
                critic_out_w=c_out_w, critic_out_b=c_out_b)


def pack_params(raw):
    """Pack both branches into 128-lane f32 slabs; pre-fuse table @ w_in."""
    P, H = raw['actor_in_w'].shape
    k = raw['phase_table'].shape[0]
    assert 2 * H <= 128, "packed layout assumes both branches fit one vreg width"
    W = 128
    K_pad = _round_up(k, 128)
    hp = jax.lax.Precision.HIGHEST

    # fused[p] = phase_table[p] @ [actor_in | critic_in] + [actor_in_b | critic_in_b]
    w_in = (jnp.zeros((P, W), jnp.float32)
            .at[:, :H].set(raw['actor_in_w'])
            .at[:, H:2 * H].set(raw['critic_in_w']))
    b_in = (jnp.zeros((W,), jnp.float32)
            .at[:H].set(raw['actor_in_b'])
            .at[H:2 * H].set(raw['critic_in_b']))
    table_pad = jnp.zeros((K_pad, P), jnp.float32).at[:k, :].set(raw['phase_table'])
    fused = jnp.dot(table_pad, w_in, precision=hp) + b_in[None, :]   # (K_pad, W)

    w_hid = (jnp.zeros((W, W), jnp.float32)
             .at[:H, :H].set(raw['actor_hid_w'])
             .at[H:2 * H, H:2 * H].set(raw['critic_hid_w']))

    consts = (jnp.zeros((8, W), jnp.float32)
              .at[0, :H].set(raw['actor_hid_b'])
              .at[0, H:2 * H].set(raw['critic_hid_b'])
              .at[1, H:2 * H].set(raw['critic_out_w'][:, 0])
              .at[2, 0].set(raw['critic_out_b'][0]))

    return dict(fused=fused, w_hid=w_hid, consts=consts)


# ----------------------------------------------------------------------------
# Forward wrapper (matches MLPBaseSimplePhase.forward semantics).
# ----------------------------------------------------------------------------
@functools.partial(jax.jit, static_argnames=('k', 'hid_sz'))
def forward(packed, inputs, states, masks, *, k, hid_sz):
    del masks  # unused by the reference forward
    B = inputs.shape[0]
    H = hid_sz

    # phase = round(step_count) % k  (torch.round is round-half-to-even, as is
    # jnp.round; the reference asserts the column is integral anyway).
    step = jnp.round(inputs[:, -1]).astype(jnp.int32)
    phase = jnp.mod(step, k).astype(jnp.int32).reshape(B, 1)

    TB = _choose_tile(B)
    B_pad = _round_up(B, TB)
    if B_pad != B:
        phase = jnp.pad(phase, ((0, B_pad - B), (0, 0)))

    const = lambda i: (0, 0)              # weights: VMEM-resident across tiles
    kernel = functools.partial(mlp_simple_phase_kernel, hid_sz=H)

    actor, critic = pl.pallas_call(
        kernel,
        out_shape=(jax.ShapeDtypeStruct((B_pad, H), jnp.float32),
                   jax.ShapeDtypeStruct((B_pad, 1), jnp.float32)),
        grid=(B_pad // TB,),
        in_specs=[
            pl.BlockSpec((TB, 1), lambda i: (i, 0)),        # int32 phase (tiled)
            pl.BlockSpec(packed['fused'].shape, const),     # fused table+in_fc
            pl.BlockSpec(packed['w_hid'].shape, const),     # block-diag hid_fc
            pl.BlockSpec(packed['consts'].shape, const),    # biases + critic head
        ],
        out_specs=(pl.BlockSpec((TB, H), lambda i: (i, 0)),
                   pl.BlockSpec((TB, 1), lambda i: (i, 0))),
        compiler_params=pltpu.CompilerParams(
            dimension_semantics=("parallel",)),             # v7x: shard batch tiles
    )(phase, packed['fused'], packed['w_hid'], packed['consts'])

    if B_pad != B:
        actor = actor[:B]
        critic = critic[:B]
    return critic, actor, states


# ----------------------------------------------------------------------------
# Pure-JAX reference (mirrors the PyTorch module) for a correctness check.
# ----------------------------------------------------------------------------
def reference_forward(raw, inputs, states, masks, *, k):
    del masks
    hp = jax.lax.Precision.HIGHEST
    step = jnp.round(inputs[:, -1]).astype(jnp.int32)
    phase = jnp.mod(step, k)
    emb = jnp.take(raw['phase_table'], phase, axis=0)

    hc = jnp.tanh(jnp.dot(emb, raw['critic_in_w'], precision=hp) + raw['critic_in_b'])
    hc = jnp.tanh(jnp.dot(hc, raw['critic_hid_w'], precision=hp) + raw['critic_hid_b'])
    critic = jnp.dot(hc, raw['critic_out_w'], precision=hp) + raw['critic_out_b']

    ha = jnp.tanh(jnp.dot(emb, raw['actor_in_w'], precision=hp) + raw['actor_in_b'])
    ha = jnp.tanh(jnp.dot(ha, raw['actor_hid_w'], precision=hp) + raw['actor_hid_b'])
    return critic, ha, states


def _check(raw, packed, inputs, states, masks, opt):
    critic, actor, out_states = forward(
        packed, inputs, states, masks,
        k=opt['phase_period'], hid_sz=opt['hid_sz'])
    jax.block_until_ready((critic, actor, out_states))

    B = inputs.shape[0]
    assert critic.shape == (B, 1)
    assert actor.shape == (B, opt['hid_sz'])
    assert out_states.shape == states.shape

    ref_critic, ref_actor, _ = reference_forward(
        raw, inputs, states, masks, k=opt['phase_period'])
    assert jnp.allclose(critic, ref_critic, atol=1e-4, rtol=1e-4), \
        float(jnp.max(jnp.abs(critic - ref_critic)))
    assert jnp.allclose(actor, ref_actor, atol=1e-4, rtol=1e-4), \
        float(jnp.max(jnp.abs(actor - ref_actor)))


if __name__ == "__main__":
    opt = dict(
        phase_hid_sz=16,   # param_sz
        phase_period=10,   # k
        hid_sz=32,
    )
    num_inputs = 9         # 8 obs features + trailing step-count column

    key = jax.random.PRNGKey(0)
    pkey, okey, skey, okey2, skey2 = jax.random.split(key, 5)

    raw = make_params(pkey, opt)
    packed = pack_params(raw)

    def make_inputs(okey, skey, B):
        obs = jax.random.normal(okey, (B, num_inputs - 1), dtype=jnp.float32)
        steps = jax.random.randint(skey, (B, 1), 0, 100).astype(jnp.float32)
        inputs = jnp.concatenate([obs, steps], axis=1)
        states = jnp.zeros((B, 1), dtype=jnp.float32)
        masks = jnp.ones((B, 1), dtype=jnp.float32)
        return inputs, states, masks

    # Small batch (single-tile path).
    inputs, states, masks = make_inputs(okey, skey, 8)
    _check(raw, packed, inputs, states, masks, opt)

    # Larger batch exercising the multi-step "parallel" grid + padding path.
    inputs2, states2, masks2 = make_inputs(okey2, skey2, 600)
    _check(raw, packed, inputs2, states2, masks2, opt)

    print("KERNEL_OK")
</pallas_src>

<mosaic_0001>
module attributes {stable_mosaic.version = 11 : i64} {
  func.func @mlp_simple_phase_kernel(%arg0: i32, %arg1: memref<8x1xi32, #tpu.memory_space<vmem>>, %arg2: memref<128x128xf32, #tpu.memory_space<vmem>>, %arg3: memref<128x128xf32, #tpu.memory_space<vmem>>, %arg4: memref<8x128xf32, #tpu.memory_space<vmem>>, %arg5: memref<8x32xf32, #tpu.memory_space<vmem>>, %arg6: memref<8x1xf32, #tpu.memory_space<vmem>>) attributes {dimension_semantics = [#tpu.dimension_semantics<parallel>], iteration_bounds = array<i64: 1>, scalar_prefetch = 0 : i64, scratch_operands = 0 : i64, tpu.core_type = #tpu.core_type<tc>, window_params = [{transform_indices = @transform_0, window_bounds = array<i64: 8, 1>}, {pipeline_mode = #tpu.pipeline_mode<synchronous>, transform_indices = @transform_1, window_bounds = array<i64: 128, 128>}, {pipeline_mode = #tpu.pipeline_mode<synchronous>, transform_indices = @transform_2, window_bounds = array<i64: 128, 128>}, {pipeline_mode = #tpu.pipeline_mode<synchronous>, transform_indices = @transform_3, window_bounds = array<i64: 8, 128>}, {transform_indices = @transform_4, window_bounds = array<i64: 8, 32>}, {transform_indices = @transform_5, window_bounds = array<i64: 8, 1>}]} {
    %c0 = arith.constant 0 : index
    %c0_0 = arith.constant 0 : index
    %0 = vector.load %arg1[%c0, %c0_0] : memref<8x1xi32, #tpu.memory_space<vmem>>, vector<8x1xi32>
    %1 = tpu.iota {dimensions = array<i32: 1>} : vector<8x128xi32>
    %2 = vector.broadcast %0 : vector<8x1xi32> to vector<8x128xi32>
    %3 = arith.cmpi eq, %1, %2 : vector<8x128xi32>
    %4 = arith.extui %3 : vector<8x128xi1> to vector<8x128xi32>
    %5 = arith.sitofp %4 : vector<8x128xi32> to vector<8x128xf32>
    %c0_1 = arith.constant 0 : index
    %c0_2 = arith.constant 0 : index
    %6 = vector.load %arg2[%c0_1, %c0_2] : memref<128x128xf32, #tpu.memory_space<vmem>>, vector<128x128xf32>
    %cst = arith.constant dense<0.000000e+00> : vector<8x128xf32>
    %7 = tpu.matmul %5, %6, %cst {dimension_numbers = #tpu.dot_dimension_numbers<[1], [0], [0], [1], [0, 0, 1, 1], [], []>} : vector<8x128xf32>, vector<128x128xf32>, vector<8x128xf32> -> vector<8x128xf32>
    %8 = math.tanh %7 : vector<8x128xf32>
    %c0_3 = arith.constant 0 : index
    %c0_4 = arith.constant 0 : index
    %9 = vector.load %arg4[%c0_3, %c0_4] : memref<8x128xf32, #tpu.memory_space<vmem>>, vector<1x128xf32>
    %c0_5 = arith.constant 0 : index
    %c0_6 = arith.constant 0 : index
    %10 = vector.load %arg3[%c0_5, %c0_6] : memref<128x128xf32, #tpu.memory_space<vmem>>, vector<128x128xf32>
    %cst_7 = arith.constant dense<0.000000e+00> : vector<8x128xf32>
    %11 = tpu.matmul %8, %10, %cst_7 {dimension_numbers = #tpu.dot_dimension_numbers<[1], [0], [0], [1], [0, 0, 1, 1], [], []>} : vector<8x128xf32>, vector<128x128xf32>, vector<8x128xf32> -> vector<8x128xf32>
    %12 = vector.broadcast %9 : vector<1x128xf32> to vector<8x128xf32>
    %13 = arith.addf %11, %12 : vector<8x128xf32>
    %14 = math.tanh %13 : vector<8x128xf32>
    %c1 = arith.constant 1 : index
    %c0_8 = arith.constant 0 : index
    %15 = vector.load %arg4[%c1, %c0_8] : memref<8x128xf32, #tpu.memory_space<vmem>>, vector<1x128xf32>
    %c2 = arith.constant 2 : index
    %c0_9 = arith.constant 0 : index
    %16 = vector.load %arg4[%c2, %c0_9] : memref<8x128xf32, #tpu.memory_space<vmem>>, vector<1x1xf32>
    %17 = vector.broadcast %15 : vector<1x128xf32> to vector<8x128xf32>
    %18 = arith.mulf %14, %17 : vector<8x128xf32>
    %cst_10 = arith.constant dense<0.000000e+00> : vector<8xf32>
    %19 = vector.multi_reduction <add>, %18, %cst_10 [1] : vector<8x128xf32> to vector<8xf32>
    %20 = vector.shape_cast %19 : vector<8xf32> to vector<8x1xf32>
    %21 = vector.broadcast %16 : vector<1x1xf32> to vector<8x1xf32>
    %22 = arith.addf %20, %21 : vector<8x1xf32>
    %23 = vector.extract_strided_slice %14 {offsets = [0, 0], sizes = [8, 32], strides = [1, 1]} : vector<8x128xf32> to vector<8x32xf32>
    %c0_11 = arith.constant 0 : index
    %c0_12 = arith.constant 0 : index
    %24 = vector.load %arg5[%c0_11, %c0_12] : memref<8x32xf32, #tpu.memory_space<vmem>>, vector<8x32xf32>
    tpu.vector_store %arg5[%c0_11, %c0_12], %23 {strides = array<i32>} : memref<8x32xf32, #tpu.memory_space<vmem>>, vector<8x32xf32>,
    %c0_13 = arith.constant 0 : index
    %c0_14 = arith.constant 0 : index
    %25 = vector.load %arg6[%c0_13, %c0_14] : memref<8x1xf32, #tpu.memory_space<vmem>>, vector<8x1xf32>
    tpu.vector_store %arg6[%c0_13, %c0_14], %22 {strides = array<i32>} : memref<8x1xf32, #tpu.memory_space<vmem>>, vector<8x1xf32>,
    return
  }
  func.func @transform_0(%arg0: i32) -> (i32, i32) {
    %c0_i32 = arith.constant 0 : i32
    %c0_i32_0 = arith.constant 0 : i32
    return %arg0, %c0_i32 : i32, i32
  }
  func.func @transform_1(%arg0: i32) -> (i32, i32) {
    %c0_i32 = arith.constant 0 : i32
    %c0_i32_0 = arith.constant 0 : i32
    %c0_i32_1 = arith.constant 0 : i32
    return %c0_i32, %c0_i32_0 : i32, i32
  }
  func.func @transform_2(%arg0: i32) -> (i32, i32) {
    %c0_i32 = arith.constant 0 : i32
    %c0_i32_0 = arith.constant 0 : i32
    %c0_i32_1 = arith.constant 0 : i32
    return %c0_i32, %c0_i32_0 : i32, i32
  }
  func.func @transform_3(%arg0: i32) -> (i32, i32) {
    %c0_i32 = arith.constant 0 : i32
    %c0_i32_0 = arith.constant 0 : i32
    %c0_i32_1 = arith.constant 0 : i32
    return %c0_i32, %c0_i32_0 : i32, i32
  }
  func.func @transform_4(%arg0: i32) -> (i32, i32) {
    %c0_i32 = arith.constant 0 : i32
    %c0_i32_0 = arith.constant 0 : i32
    return %arg0, %c0_i32 : i32, i32
  }
  func.func @transform_5(%arg0: i32) -> (i32, i32) {
    %c0_i32 = arith.constant 0 : i32
    %c0_i32_0 = arith.constant 0 : i32
    return %arg0, %c0_i32 : i32, i32
  }
}

</mosaic_0001>

<bundles_post_ra>
// kernel: forward.1
= control target key start
LH: loop header
LB: loop body
LE: loop exit
PB: predicated region body
PF: predicated region fallthrough
CT: control target
= control target key end

     0   :  { %11 = vsyncpa [#allocation3], 0  ;;  %s625_s0 = inlined_call_operand.vmem [shape: s32[8,1], index: 0, kind: input, shape index: {}]   ;;  %s626_s1 = inlined_call_operand.hbm [shape: f32[128,128], index: 1, kind: input, shape index: {}]   ;;  %s627_s2 = inlined_call_operand.hbm [shape: f32[128,128], index: 2, kind: input, shape index: {}]   ;;  %s628_s3 = inlined_call_operand.vmem [shape: f32[8,128], index: 3, kind: input, shape index: {}]   ;;  %s629_s4 = inlined_call_operand.hbm [shape: f32[8,32], index: 4, kind: output, shape index: {0}]   ;;  %s630_s5 = inlined_call_operand.vmem [shape: f32[8,1], index: 5, kind: output, shape index: {1}]  }
   0x1   :  { %12 = vsyncpa [#allocation6], 0 }
   0x2   :  { %13 = vsyncpa [#allocation4], 0  ;;  %s518_s18 = smov [#allocation2]   ;;  %s446_s22 = scalar_lea.hbm %s626_s1, 2048 }
   0x3   :  { %s21_s19 = sshll.u32 %s518_s18, 4  ;;  %p447_p0 = scmp.ne.s32.totalorder %s626_s1, %s446_s22  ;;  %s22_s19 = int_to_ptr.vmem [resolvable:$true] %s21_s19 }
   0x4   :  { %p450_p1 = scmp.lt.u32.totalorder %s446_s22, %s626_s1 }
   0x6   :  { %p452_p2 = pnand %p450_p1, %p447_p0 }
   0x8   :  { %455 = shalt.err (!%p452_p2)
}
   0x9   :  { %s456_s27 = scalar_lea.vmem %s22_s19, 2048  ;;  %p461_p4 = scmp.lt.s32.totalorder %s22_s19, %s22_s19 }
   0xa   :  { %p457_p3 = scmp.ne.s32.totalorder %s22_s19, %s456_s27  ;;  %p462_p5 = scmp.lt.s32.totalorder %s456_s27, %s456_s27 }
   0xc   :  { %p463_p6 = por %p462_p5, %p461_p4 }
   0xe   :  { %p464_p7 = pnand %p463_p6, %p457_p3 }
  0x10   :  { %467 = shalt.err (!%p464_p7)
}
  0x11   :  { %s519_s28 = smov 128   ;;  %s520_s29 = smov 8  }
  0x12   :  { %27 = dma.hbm_to_vmem [thread:$0]  %s626_s1, 2048, %s22_s19, [#allocation3], %s519_s28, %s519_s28, %s520_s29  }
  0x13   :  { %s521_s7 = smov [#allocation5]   ;;  %s468_s11 = scalar_lea.hbm %s627_s2, 2048 }
  0x14   :  { %s33_s8 = sshll.u32 %s521_s7, 4  ;;  %p469_p8 = scmp.ne.s32.totalorder %s627_s2, %s468_s11  ;;  %s34_s8 = int_to_ptr.vmem [resolvable:$true] %s33_s8 }
  0x15   :  { %p472_p9 = scmp.lt.u32.totalorder %s468_s11, %s627_s2 }
  0x17   :  { %p474_p10 = pnand %p472_p9, %p469_p8 }
  0x19   :  { %477 = shalt.err (!%p474_p10)
}
  0x1a   :  { %s478_s16 = scalar_lea.vmem %s34_s8, 2048  ;;  %p483_p12 = scmp.lt.s32.totalorder %s34_s8, %s34_s8 }
  0x1b   :  { %p479_p11 = scmp.ne.s32.totalorder %s34_s8, %s478_s16  ;;  %p484_p13 = scmp.lt.s32.totalorder %s478_s16, %s478_s16 }
  0x1d   :  { %p485_p0 = por %p484_p13, %p483_p12 }
  0x1f   :  { %p486_p1 = pnand %p485_p0, %p479_p11 }
  0x21   :  { %489 = shalt.err (!%p486_p1)
}
  0x22   :  { %39 = dma.hbm_to_vmem [thread:$0]  %s627_s2, 2048, %s34_s8, [#allocation6], %s519_s28, %s519_s28, %s520_s29  }
  0x23   :  { %512 = dma.done.wait [#allocation3], 2048  }
  0x24   :  { %513 = vsyncadd [#allocation3], 4294965248 }
  0x25   :  { %514 = dma.done.wait [#allocation6], 2048  }
  0x26   :  { %515 = vsyncadd [#allocation6], 4294965248  ;;  %v522_v0 = vmov 0   ;;  %v523_v1 = vmov 0.0|0.0   ;;  %v48_v2 = vld [vmem:[%s625_s0] sm:$0xff]  ;;  %v58_v4 = vld [vmem:[#allocation2 + $0x8] sm:$0xff]  ;;  %v49_v43 = vlaneseq }
  0x27   :  { %441 = vset.pattern.permute.xlu0 %v522_v0  ;;  %383 = vmatprep.subr.bf16.mxu0 %v523_v1  ;;  %v57_v3 = vld [vmem:[#allocation2] sm:$0xff]  ;;  %v59_v6 = vld [vmem:[#allocation2 + $0x10] sm:$0xff]  ;;  %v60_v7 = vld [vmem:[#allocation2 + $0x18] sm:$0xff]  ;;  %vm524_vm0 = vmmov 0   ;;  %v525_v8 = vmov 0.0   ;;  %v526_v46 = vmov 1.0  }
  0x28   :  { %407 = vmatprep.subr.bf16.mxu1 %v523_v1  ;;  %52 = vperm.xlu0 %441, %v48_v2   ;;  %v384_v5 = vpack.c.bf16 %v58_v4, %v57_v3  ;;  %v387_v9 = vpack.c.bf16 %v60_v7, %v59_v6  ;;  %v61_v10 = vld [vmem:[#allocation2 + $0x20] sm:$0xff]  ;;  %v62_v11 = vld [vmem:[#allocation2 + $0x28] sm:$0xff]  ;;  %v147_v14 = vld [vmem:[#allocation5 + $0x10] sm:$0xff]  ;;  %v50_v44 = vand.u32 127, %v49_v43  ;;  %vm250_vm2 = vcmask 261120   ;;  %s527_s22 = smov [#allocation7]  }
  0x29   :  { %345 = vmatprep.mubr.msk.f32.mxu0 %vm524_vm0, %v525_v8  ;;  %380 = vmatprep.mubr.msk.f32.mxu1 %vm524_vm0, %v525_v8  ;;  %v145_v12 = vld [vmem:[#allocation5] sm:$0xff]  ;;  %v146_v13 = vld [vmem:[#allocation5 + $0x8] sm:$0xff]  ;;  %v148_v15 = vld [vmem:[#allocation5 + $0x18] sm:$0xff]  ;;  %v390_v16 = vpack.c.bf16 %v62_v11, %v61_v10  ;;  %s260_s23 = sshll.u32 %s527_s22, 4  ;;  %s261_s23 = int_to_ptr.vmem [resolvable:$true] %s260_s23 }
  0x2a   :  { %385 = vmatpush3.bf16.msra.mxu0 %v384_v5  ;;  %v408_v17 = vpack.c.bf16 %v146_v13, %v145_v12  ;;  %v63_v18 = vld [vmem:[#allocation2 + $0x30] sm:$0xff]  ;;  %v64_v19 = vld [vmem:[#allocation2 + $0x38] sm:$0xff]  ;;  %v411_v20 = vpack.c.bf16 %v148_v15, %v147_v14  ;;  %v149_v21 = vld [vmem:[#allocation5 + $0x20] sm:$0xff]  ;;  %s490_s24 = scalar_lea.vmem %s261_s23, 128  ;;  %p495_p3 = scmp.lt.s32.totalorder %s261_s23, %s261_s23 }
  0x2b   :  { %386 = vmatprep.subr.bf16.mxu0 %v523_v1  ;;  %v150_v22 = vld [vmem:[#allocation5 + $0x28] sm:$0xff]  ;;  %v393_v23 = vpack.c.bf16 %v64_v19, %v63_v18  ;;  %v65_v24 = vld [vmem:[#allocation2 + $0x40] sm:$0xff]  ;;  %v151_v27 = vld [vmem:[#allocation5 + $0x30] sm:$0xff]  ;;  %p491_p2 = scmp.ne.s32.totalorder %s261_s23, %s490_s24  ;;  %p496_p4 = scmp.lt.s32.totalorder %s490_s24, %s490_s24 }
  0x2c   :  { %409 = vmatpush3.bf16.msra.mxu1 %v408_v17  ;;  %v66_v25 = vld [vmem:[#allocation2 + $0x48] sm:$0xff]  ;;  %v414_v26 = vpack.c.bf16 %v150_v22, %v149_v21  ;;  %v152_v28 = vld [vmem:[#allocation5 + $0x38] sm:$0xff]  ;;  %v67_v30 = vld [vmem:[#allocation2 + $0x50] sm:$0xff] }
  0x2d   :  { %410 = vmatprep.subr.bf16.mxu1 %v523_v1  ;;  %v396_v29 = vpack.c.bf16 %v66_v25, %v65_v24  ;;  %v68_v31 = vld [vmem:[#allocation2 + $0x58] sm:$0xff]  ;;  %v417_v32 = vpack.c.bf16 %v152_v28, %v151_v27  ;;  %v153_v33 = vld [vmem:[#allocation5 + $0x40] sm:$0xff]  ;;  %v154_v34 = vld [vmem:[#allocation5 + $0x48] sm:$0xff]  ;;  %p497_p5 = por %p496_p4, %p495_p3 }
  0x2e   :  { %388 = vmatpush3.bf16.msra.mxu0 %v387_v9  ;;  %v399_v35 = vpack.c.bf16 %v68_v31, %v67_v30  ;;  %v69_v36 = vld [vmem:[#allocation2 + $0x60] sm:$0xff]  ;;  %v70_v37 = vld [vmem:[#allocation2 + $0x68] sm:$0xff]  ;;  %v420_v38 = vpack.c.bf16 %v154_v34, %v153_v33  ;;  %v71_v40 = vld [vmem:[#allocation2 + $0x70] sm:$0xff] }
  0x2f   :  { %389 = vmatprep.subr.bf16.mxu0 %v523_v1  ;;  %v402_v39 = vpack.c.bf16 %v70_v37, %v69_v36  ;;  %v72_v41 = vld [vmem:[#allocation2 + $0x78] sm:$0xff]  ;;  %v155_v47 = vld [vmem:[#allocation5 + $0x50] sm:$0xff]  ;;  %v157_v50 = vld [vmem:[#allocation5 + $0x60] sm:$0xff]  ;;  %p498_p6 = pnand %p497_p5, %p491_p2 }
  0x30   :  { %412 = vmatpush3.bf16.msra.mxu1 %v411_v20  ;;  %v405_v42 = vpack.c.bf16 %v72_v41, %v71_v40  ;;  %v156_v48 = vld [vmem:[#allocation5 + $0x58] sm:$0xff]  ;;  %v158_v51 = vld [vmem:[#allocation5 + $0x68] sm:$0xff]  ;;  %v159_v53 = vld [vmem:[#allocation5 + $0x70] sm:$0xff] }
  0x31   :  { %413 = vmatprep.subr.bf16.mxu1 %v523_v1  ;;  %v423_v49 = vpack.c.bf16 %v156_v48, %v155_v47  ;;  %v426_v52 = vpack.c.bf16 %v158_v51, %v157_v50  ;;  %v160_v54 = vld [vmem:[#allocation5 + $0x78] sm:$0xff]  ;;  %v276_v59 = vld [vmem:[%s628_s3] ss:$0 sm:$0xff]  ;;  %v277_v63 = vld [vmem:[%s628_s3 + $0x1] ss:$0 sm:$0xff] }
  0x32   :  { %391 = vmatpush3.bf16.msra.mxu0 %v390_v16  ;;  %v429_v55 = vpack.c.bf16 %v160_v54, %v159_v53 }
  0x33   :  { %392 = vmatprep.subr.bf16.mxu0 %v523_v1 }
  0x34   :  { %415 = vmatpush3.bf16.msra.mxu1 %v414_v26 }
  0x35   :  { %416 = vmatprep.subr.bf16.mxu1 %v523_v1 }
  0x36   :  { %394 = vmatpush3.bf16.msra.mxu0 %v393_v23 }
  0x37   :  { %395 = vmatprep.subr.bf16.mxu0 %v523_v1 }
  0x38   :  { %418 = vmatpush3.bf16.msra.mxu1 %v417_v32 }
  0x39   :  { %419 = vmatprep.subr.bf16.mxu1 %v523_v1 }
  0x3a   :  { %397 = vmatpush3.bf16.msra.mxu0 %v396_v29 }
  0x3b   :  { %398 = vmatprep.subr.bf16.mxu0 %v523_v1 }
  0x3c   :  { %421 = vmatpush3.bf16.msra.mxu1 %v420_v38 }
  0x3d   :  { %422 = vmatprep.subr.bf16.mxu1 %v523_v1 }
  0x3e   :  { %400 = vmatpush3.bf16.msra.mxu0 %v399_v35 }
  0x3f   :  { %401 = vmatprep.subr.bf16.mxu0 %v523_v1 }
  0x40   :  { %424 = vmatpush3.bf16.msra.mxu1 %v423_v49 }
  0x41   :  { %425 = vmatprep.subr.bf16.mxu1 %v523_v1 }
  0x42   :  { %403 = vmatpush3.bf16.msra.mxu0 %v402_v39 }
  0x43   :  { %404 = vmatprep.subr.bf16.mxu0 %v523_v1 }
  0x44   :  { %427 = vmatpush3.bf16.msra.mxu1 %v426_v52 }
  0x45   :  { %428 = vmatprep.subr.bf16.mxu1 %v523_v1 }
  0x46   :  { %406 = vmatpush3.bf16.msra.mxu0 %v405_v42 }
  0x48   :  { %430 = vmatpush3.bf16.msra.mxu1 %v429_v55 }
  0xa7   :  { %v53_v45 = vpop.permute.xlu0 %52 }
  0xa8   :  { %vm54_vm1 = vcmp.eq.s32.totalorder %v50_v44, %v53_v45 }
  0xa9   :  { %346 = vmatmul.mubr.msk.f32.vlgmr.msra.gmra.mrb[0].mxu0 %vm54_vm1, %v526_v46 }
 0x17c   :  { %v139_v56 = vpop.f32.mrb[0].mxu0 }
 0x17d   :  { %442 = vtanh.f32 %v139_v56  ;;  %v347_v57 = vpop.f32.mrb[1].mxu0 }
 0x187   :  { %v443_v58 = vpop.eup %442 }
 0x188   :  { %381 = vmatmul.mubr.f32.vlgmr.msra.gmra.mrb[0].mxu1 %v443_v58 }
 0x25b   :  { %v231_v60 = vpop.f32.mrb[0].mxu1 }
 0x25c   :  { %v232_v61 = vadd.f32 %v276_v59, %v231_v60  ;;  %v382_v62 = vpop.f32.mrb[1].mxu1 }
 0x25e   :  { %444 = vtanh.f32 %v232_v61 }
 0x268   :  { %v445_v0 = vpop.eup %444 }
 0x269   :  { %v242_v1 = vmul.f32 %v445_v0, %v277_v63  ;;  %251 = vst.msk [vmem:[#allocation7] sm:$0xff] %vm250_vm2, %v445_v0 }
 0x26b   :  { %243 = vadd.xlane.f32.xlu0 %v242_v1 }
 0x26c   :  { %501 = shalt.err (!%p498_p6)
}
 0x26d   :  { %s502_s27 = scalar_lea.hbm %s629_s4, 128 }
 0x26e   :  { %p503_p7 = scmp.ne.s32.totalorder %s629_s4, %s502_s27  ;;  %p506_p8 = scmp.lt.u32.totalorder %s502_s27, %s629_s4 }
 0x270   :  { %p508_p9 = pnand %p506_p8, %p503_p7 }
 0x272   :  { %511 = shalt.err (!%p508_p9)
}
 0x273   :  { %263 = dma.vmem_to_hbm [thread:$0]  %s261_s23, 128, %s629_s4, [#allocation4]   ;;  %v278_v2 = vld [vmem:[%s628_s3 + $0x2] ss:$0 sm:$0xff]  ;;  %vm252_vm3 = vcmask 7168  }
 0x2f8   :  { %v244_v3 = vpop.xlane.xlu0 %243 }
 0x2f9   :  { %v249_v4 = vadd.f32 %v278_v2, %v244_v3 }
 0x2fb   :  { %253 = vst.msk [vmem:[%s630_s5] sm:$0xff] %vm252_vm3, %v249_v4 }
 0x2fc   :  { %516 = dma.done.wait [#allocation4], 128  }
 0x2fd   :  { %517 = vsyncadd [#allocation4], 4294967168 }
 0x2fe   :  { %271 = vsyncpa [#allocation3], 1 }
 0x2ff   :  { %272 = vsyncpa [#allocation6], 1 }
 0x300   :  { %273 = vsyncpa [#allocation4], 1 }

</bundles_post_ra>
